<compile_context>
chip_gen: v5e
topology: v5e:2x2
jax: 0.10.0
libtpu: 0.0.40
codegen_flags: <defaults>
</compile_context>

<pallas_src>
import functools

import jax
import jax.numpy as jnp
from jax.experimental import pallas as pl
from jax.experimental.pallas import tpu as pltpu


def _round_up(n, m):
    return ((n + m - 1) // m) * m


# ---------------------------------------------------------------------------
# Kernels
# ---------------------------------------------------------------------------
def _dueling_kernel(x_ref, wcat_ref, bcat_ref, w2_ref, b2_ref, out_ref, *,
                    d_pad, inv_a):
    x = x_ref[...]                                                  # [TB, D]
    # One fused MXU dot for both streams that share x as LHS.
    fused = jnp.dot(x, wcat_ref[...],
                    preferred_element_type=jnp.float32) + bcat_ref[...]
    h = jnp.maximum(fused[:, :d_pad], 0.0)                          # value hidden (ReLU)
    adv = fused[:, d_pad:]                                          # advantage (padded lanes == 0)
    # D -> 1 value projection on the VPU/XLU (MXU with N=1 is wasteful).
    val = jnp.sum(h * w2_ref[...], axis=-1, keepdims=True) + b2_ref[0]   # [TB, 1]
    # Padded adv lanes are exactly zero, so the padded-lane sum == true sum.
    adv_mean = jnp.sum(adv, axis=-1, keepdims=True) * inv_a
    out_ref[...] = (val + (adv - adv_mean)).astype(out_ref.dtype)


def _dueling_kernel_masked(x_ref, wcat_ref, bcat_ref, w2_ref, b2_ref,
                           mask_ref, out_ref, *, d_pad, inv_a):
    x = x_ref[...]
    fused = jnp.dot(x, wcat_ref[...],
                    preferred_element_type=jnp.float32) + bcat_ref[...]
    h = jnp.maximum(fused[:, :d_pad], 0.0)
    adv = fused[:, d_pad:]
    val = jnp.sum(h * w2_ref[...], axis=-1, keepdims=True) + b2_ref[0]
    adv_mean = jnp.sum(adv, axis=-1, keepdims=True) * inv_a
    res = val + (adv - adv_mean)
    # available-actions masking: res[mask == 0] = -1e10 (integer mask -> robust)
    res = jnp.where(mask_ref[...] == 0, jnp.float32(-10000000000.0), res)
    out_ref[...] = res.astype(out_ref.dtype)


# ---------------------------------------------------------------------------
# pallas_call builder
# ---------------------------------------------------------------------------
def _pallas_forward(x_pad, wcat, bcat, w2row, b2, mask_pad, *,
                    block_b, d_in, d_pad, a_pad, a_true):
    bp = x_pad.shape[0]
    wcols = d_pad + a_pad
    grid = (bp // block_b,)

    kernel = _dueling_kernel if mask_pad is None else _dueling_kernel_masked
    kernel = functools.partial(kernel, d_pad=d_pad, inv_a=1.0 / float(a_true))

    in_specs = [
        pl.BlockSpec((block_b, d_in), lambda i: (i, 0)),          # x tile
        pl.BlockSpec((d_in, wcols), lambda i: (0, 0)),            # fused weight
        pl.BlockSpec((1, wcols), lambda i: (0, 0)),               # fused bias
        pl.BlockSpec((1, d_pad), lambda i: (0, 0)),               # W2 as a row
        pl.BlockSpec(memory_space=pltpu.MemorySpace.SMEM),        # b2 scalar (SMEM)
    ]
    args = [x_pad, wcat, bcat, w2row, b2]
    if mask_pad is not None:
        in_specs.append(pl.BlockSpec((block_b, a_pad), lambda i: (i, 0)))
        args.append(mask_pad)

    flops = 2 * bp * d_in * wcols + 4 * bp * (d_pad + a_pad)
    bytes_accessed = 4 * (x_pad.size + wcat.size + bcat.size + w2row.size
                          + b2.size + bp * a_pad)
    if mask_pad is not None:
        bytes_accessed += 4 * mask_pad.size

    return pl.pallas_call(
        kernel,
        out_shape=jax.ShapeDtypeStruct((bp, a_pad), jnp.float32),
        grid_spec=pltpu.PrefetchScalarGridSpec(
            num_scalar_prefetch=0,
            grid=grid,
            in_specs=in_specs,
            out_specs=pl.BlockSpec((block_b, a_pad), lambda i: (i, 0)),
        ),
        compiler_params=pltpu.CompilerParams(
            dimension_semantics=("parallel",),
            vmem_limit_bytes=32 * 1024 * 1024,
        ),
        cost_estimate=pl.CostEstimate(
            flops=flops, transcendentals=0, bytes_accessed=bytes_accessed),
    )(*args)


# ---------------------------------------------------------------------------
# jitted forwards (mask / no-mask variants; ragged-batch safe)
# ---------------------------------------------------------------------------
@functools.partial(jax.jit,
                   static_argnames=("block_b", "a_true", "d_pad", "a_pad"))
def _forward_nomask(x, wcat, bcat, w2row, b2, *, block_b, a_true, d_pad, a_pad):
    B, D = x.shape
    tb = min(_round_up(block_b, 8), _round_up(B, 8))
    bp = _round_up(B, tb)
    if bp != B:
        x = jnp.pad(x, ((0, bp - B), (0, 0)))
    return _pallas_forward(x, wcat, bcat, w2row, b2, None, block_b=tb,
                           d_in=D, d_pad=d_pad, a_pad=a_pad, a_true=a_true)


@functools.partial(jax.jit,
                   static_argnames=("block_b", "a_true", "d_pad", "a_pad"))
def _forward_masked(x, wcat, bcat, w2row, b2, mask, *, block_b, a_true,
                    d_pad, a_pad):
    B, D = x.shape
    A = mask.shape[1]
    tb = min(_round_up(block_b, 8), _round_up(B, 8))
    bp = _round_up(B, tb)
    if bp != B:
        x = jnp.pad(x, ((0, bp - B), (0, 0)))
    mask_pad = jnp.ones((bp, a_pad), jnp.int32)
    mask_pad = mask_pad.at[:B, :A].set(mask)
    return _pallas_forward(x, wcat, bcat, w2row, b2, mask_pad, block_b=tb,
                           d_in=D, d_pad=d_pad, a_pad=a_pad, a_true=a_true)


# ---------------------------------------------------------------------------
# Module wrapper
# ---------------------------------------------------------------------------
class LinearDuelingDQNPallas:
    """Deterministically-initialized dueling DQN head running on TPU via Pallas."""

    # TODO(synk): PyTorch's orthogonal/xavier init with `gain` is replaced by a
    # deterministic JAX xavier-uniform-like init; semantics of forward() are
    # identical for any given weights.
    def __init__(self, num_inputs, num_outputs, key, block_b=256):
        D, A = num_inputs, num_outputs
        self.D, self.A = D, A
        self.d_pad = _round_up(D, 128)   # value-hidden lanes, padded to 128
        self.a_pad = _round_up(A, 128)   # advantage lanes, padded to 128
        self.block_b = block_b           # batch tile (tunable, multiple of 8)

        k1, k2, k3 = jax.random.split(key, 3)

        def xavier(k, fan_in, fan_out):
            lim = (6.0 / (fan_in + fan_out)) ** 0.5
            return jax.random.uniform(k, (fan_in, fan_out), jnp.float32, -lim, lim)

        # Raw parameters, stored [in, out] (== PyTorch W.T); biases = 0.
        self.w1 = xavier(k1, D, D)              # fc[0]: Linear(D, D)
        self.b1 = jnp.zeros((D,), jnp.float32)
        self.w2 = xavier(k2, D, 1)              # fc[2]: Linear(D, 1)
        self.b2 = jnp.zeros((1,), jnp.float32)
        self.wadv = xavier(k3, D, A)            # fc_adv: Linear(D, A)
        self.badv = jnp.zeros((A,), jnp.float32)

        self._pack()

    def _pack(self):
        """Build fused, lane-padded parameter tensors consumed by the kernel."""
        D, A, d_pad, a_pad = self.D, self.A, self.d_pad, self.a_pad
        wcat = jnp.zeros((D, d_pad + a_pad), jnp.float32)
        wcat = wcat.at[:, :D].set(self.w1)
        wcat = wcat.at[:, d_pad:d_pad + A].set(self.wadv)
        bcat = jnp.zeros((1, d_pad + a_pad), jnp.float32)
        bcat = bcat.at[0, :D].set(self.b1)
        bcat = bcat.at[0, d_pad:d_pad + A].set(self.badv)
        w2row = jnp.zeros((1, d_pad), jnp.float32)
        w2row = w2row.at[0, :D].set(self.w2[:, 0])
        self.wcat, self.bcat, self.w2row = wcat, bcat, w2row

    def __call__(self, x, available_actions=None):
        B = x.shape[0]
        if available_actions is None:
            out = _forward_nomask(x, self.wcat, self.bcat, self.w2row, self.b2,
                                  block_b=self.block_b, a_true=self.A,
                                  d_pad=self.d_pad, a_pad=self.a_pad)
        else:
            mask = available_actions.astype(jnp.int32)
            out = _forward_masked(x, self.wcat, self.bcat, self.w2row, self.b2,
                                  mask, block_b=self.block_b, a_true=self.A,
                                  d_pad=self.d_pad, a_pad=self.a_pad)
        return out[:B, :self.A]


# ---------------------------------------------------------------------------
# Pure-JAX reference (high precision) for correctness checking
# ---------------------------------------------------------------------------
def _reference(x, m, available_actions=None):
    hp = jax.lax.Precision.HIGHEST
    adv = jnp.dot(x, m.wadv, precision=hp) + m.badv
    h = jnp.maximum(jnp.dot(x, m.w1, precision=hp) + m.b1, 0.0)
    val = jnp.dot(h, m.w2, precision=hp) + m.b2
    res = val + (adv - adv.mean(axis=1, keepdims=True))
    if available_actions is not None:
        res = jnp.where(available_actions == 0, -10000000000.0, res)
    return res


if __name__ == "__main__":
    key = jax.random.PRNGKey(0)
    kx, km, kp, kx2, km2 = jax.random.split(key, 5)

    B, D, A = 8, 32, 16                      # batch, num_inputs, num_outputs
    x = jax.random.normal(kx, (B, D), jnp.float32)
    avail = (jax.random.uniform(km, (B, A)) > 0.3).astype(jnp.float32)

    model = LinearDuelingDQNPallas(D, A, kp)

    # no mask (available_actions=None) — separate kernel variant, no mask DMA
    out1 = model(x)
    jax.block_until_ready(out1)
    ref1 = _reference(x, model)

    # with availability mask
    out2 = model(x, avail)
    jax.block_until_ready(out2)
    ref2 = _reference(x, model, avail)

    # ragged batch (exercises tail padding / cdiv-style grid handling)
    B2 = 10
    x2 = jax.random.normal(kx2, (B2, D), jnp.float32)
    avail2 = (jax.random.uniform(km2, (B2, A)) > 0.3).astype(jnp.float32)
    out3 = model(x2, avail2)
    jax.block_until_ready(out3)
    ref3 = _reference(x2, model, avail2)

    assert out1.shape == (B, A) and out2.shape == (B, A) and out3.shape == (B2, A)
    assert jnp.allclose(out1, ref1, atol=1e-4, rtol=1e-4)
    assert jnp.allclose(out2, ref2, atol=1e-4, rtol=1e-4)
    assert jnp.allclose(out3, ref3, atol=1e-4, rtol=1e-4)

    print("KERNEL_OK")
</pallas_src>

<mosaic_0001>
module attributes {stable_mosaic.version = 11 : i64} {
  func.func @_dueling_kernel(%arg0: i32, %arg1: memref<8x32xf32, #tpu.memory_space<vmem>>, %arg2: memref<32x256xf32, #tpu.memory_space<vmem>>, %arg3: memref<1x256xf32, #tpu.memory_space<vmem>>, %arg4: memref<1x128xf32, #tpu.memory_space<vmem>>, %arg5: memref<1xf32, #tpu.memory_space<smem>>, %arg6: memref<8x128xf32, #tpu.memory_space<vmem>>) attributes {dimension_semantics = [#tpu.dimension_semantics<parallel>], iteration_bounds = array<i64: 1>, scalar_prefetch = 0 : i64, scratch_operands = 0 : i64, tpu.core_type = #tpu.core_type<tc>, window_params = [{transform_indices = @transform_0, window_bounds = array<i64: 8, 32>}, {pipeline_mode = #tpu.pipeline_mode<synchronous>, transform_indices = @transform_1, window_bounds = array<i64: 32, 256>}, {pipeline_mode = #tpu.pipeline_mode<synchronous>, transform_indices = @transform_2, window_bounds = array<i64: 1, 256>}, {pipeline_mode = #tpu.pipeline_mode<synchronous>, transform_indices = @transform_3, window_bounds = array<i64: 1, 128>}, {transform_indices = @transform_4, window_bounds = array<i64: 1>}, {transform_indices = @transform_5, window_bounds = array<i64: 8, 128>}]} {
    %c0 = arith.constant 0 : index
    %c0_0 = arith.constant 0 : index
    %0 = vector.load %arg1[%c0, %c0_0] : memref<8x32xf32, #tpu.memory_space<vmem>>, vector<8x32xf32>
    %c0_1 = arith.constant 0 : index
    %c0_2 = arith.constant 0 : index
    %1 = vector.load %arg2[%c0_1, %c0_2] : memref<32x256xf32, #tpu.memory_space<vmem>>, vector<32x256xf32>
    %cst = arith.constant dense<0.000000e+00> : vector<8x256xf32>
    %2 = tpu.matmul %0, %1, %cst {dimension_numbers = #tpu.dot_dimension_numbers<[1], [0], [0], [1], [0, 0, 1, 1], [], []>} : vector<8x32xf32>, vector<32x256xf32>, vector<8x256xf32> -> vector<8x256xf32>
    %c0_3 = arith.constant 0 : index
    %c0_4 = arith.constant 0 : index
    %3 = vector.load %arg3[%c0_3, %c0_4] : memref<1x256xf32, #tpu.memory_space<vmem>>, vector<1x256xf32>
    %4 = vector.broadcast %3 : vector<1x256xf32> to vector<8x256xf32>
    %5 = arith.addf %2, %4 : vector<8x256xf32>
    %6 = vector.extract_strided_slice %5 {offsets = [0, 0], sizes = [8, 128], strides = [1, 1]} : vector<8x256xf32> to vector<8x128xf32>
    %cst_5 = arith.constant 0.000000e+00 : f32
    %7 = vector.broadcast %cst_5 : f32 to vector<8x128xf32>
    %8 = arith.maximumf %6, %7 : vector<8x128xf32>
    %9 = vector.extract_strided_slice %5 {offsets = [0, 128], sizes = [8, 128], strides = [1, 1]} : vector<8x256xf32> to vector<8x128xf32>
    %c0_6 = arith.constant 0 : index
    %c0_7 = arith.constant 0 : index
    %10 = vector.load %arg4[%c0_6, %c0_7] : memref<1x128xf32, #tpu.memory_space<vmem>>, vector<1x128xf32>
    %11 = vector.broadcast %10 : vector<1x128xf32> to vector<8x128xf32>
    %12 = arith.mulf %8, %11 : vector<8x128xf32>
    %cst_8 = arith.constant dense<0.000000e+00> : vector<8xf32>
    %13 = vector.multi_reduction <add>, %12, %cst_8 [1] : vector<8x128xf32> to vector<8xf32>
    %14 = vector.shape_cast %13 : vector<8xf32> to vector<8x1xf32>
    %c0_9 = arith.constant 0 : index
    %15 = memref.load %arg5[%c0_9] : memref<1xf32, #tpu.memory_space<smem>>
    %16 = vector.broadcast %15 : f32 to vector<8x1xf32>
    %17 = arith.addf %14, %16 : vector<8x1xf32>
    %cst_10 = arith.constant dense<0.000000e+00> : vector<8xf32>
    %18 = vector.multi_reduction <add>, %9, %cst_10 [1] : vector<8x128xf32> to vector<8xf32>
    %19 = vector.shape_cast %18 : vector<8xf32> to vector<8x1xf32>
    %cst_11 = arith.constant 6.250000e-02 : f32
    %20 = vector.broadcast %cst_11 : f32 to vector<8x1xf32>
    %21 = arith.mulf %19, %20 : vector<8x1xf32>
    %22 = vector.broadcast %21 : vector<8x1xf32> to vector<8x128xf32>
    %23 = arith.subf %9, %22 : vector<8x128xf32>
    %24 = vector.broadcast %17 : vector<8x1xf32> to vector<8x128xf32>
    %25 = arith.addf %24, %23 : vector<8x128xf32>
    %c0_12 = arith.constant 0 : index
    %c0_13 = arith.constant 0 : index
    %26 = vector.load %arg6[%c0_12, %c0_13] : memref<8x128xf32, #tpu.memory_space<vmem>>, vector<8x128xf32>
    tpu.vector_store %arg6[%c0_12, %c0_13], %25 {strides = array<i32>} : memref<8x128xf32, #tpu.memory_space<vmem>>, vector<8x128xf32>,
    return
  }
  func.func @transform_0(%arg0: i32) -> (i32, i32) {
    %c0_i32 = arith.constant 0 : i32
    %c0_i32_0 = arith.constant 0 : i32
    return %arg0, %c0_i32 : i32, i32
  }
  func.func @transform_1(%arg0: i32) -> (i32, i32) {
    %c0_i32 = arith.constant 0 : i32
    %c0_i32_0 = arith.constant 0 : i32
    %c0_i32_1 = arith.constant 0 : i32
    return %c0_i32, %c0_i32_0 : i32, i32
  }
  func.func @transform_2(%arg0: i32) -> (i32, i32) {
    %c0_i32 = arith.constant 0 : i32
    %c0_i32_0 = arith.constant 0 : i32
    %c0_i32_1 = arith.constant 0 : i32
    return %c0_i32, %c0_i32_0 : i32, i32
  }
  func.func @transform_3(%arg0: i32) -> (i32, i32) {
    %c0_i32 = arith.constant 0 : i32
    %c0_i32_0 = arith.constant 0 : i32
    %c0_i32_1 = arith.constant 0 : i32
    return %c0_i32, %c0_i32_0 : i32, i32
  }
  func.func @transform_4(%arg0: i32) -> i32 {
    %c0_i32 = arith.constant 0 : i32
    %c0_i32_0 = arith.constant 0 : i32
    return %c0_i32 : i32
  }
  func.func @transform_5(%arg0: i32) -> (i32, i32) {
    %c0_i32 = arith.constant 0 : i32
    %c0_i32_0 = arith.constant 0 : i32
    return %arg0, %c0_i32 : i32, i32
  }
}

</mosaic_0001>

<bundles_post_ra>
// kernel: _forward_nomask.1
= control target key start
LH: loop header
LB: loop body
LE: loop exit
PB: predicated region body
PF: predicated region fallthrough
CT: control target
= control target key end

     0   :  { %11 = vsyncpa [#allocation4], 0  ;;  %s285_s0 = inlined_call_operand.hbm [shape: f32[8,32], index: 0, kind: input, shape index: {}]   ;;  %s286_s1 = inlined_call_operand.hbm [shape: f32[32,256], index: 1, kind: input, shape index: {}]   ;;  %s287_s2 = inlined_call_operand.vmem [shape: f32[1,256], index: 2, kind: input, shape index: {}]   ;;  %s288_s3 = inlined_call_operand.vmem [shape: f32[1,128], index: 3, kind: input, shape index: {}]   ;;  %s289_s4 = inlined_call_operand.<no memory space> [shape: f32[1], index: 4, kind: input, shape index: {}]   ;;  %s290_s5 = inlined_call_operand.hbm [shape: f32[8,128], index: 5, kind: output, shape index: {}]  }
   0x1   :  { %12 = vsyncpa [#allocation7], 0 }
   0x2   :  { %13 = vsyncpa [#allocation5], 0  ;;  %s19_s20 = sshll.u32 %s285_s0, 4  ;;  %s232_s21 = smov [#allocation3]   ;;  %s20_s20 = int_to_ptr.hbm [resolvable:$true] %s19_s20 }
   0x3   :  { %s21_s22 = sshll.u32 %s232_s21, 4  ;;  %s29_s25 = sshll.u32 %s286_s1, 4  ;;  %s22_s22 = int_to_ptr.vmem [resolvable:$true] %s21_s22  ;;  %s30_s25 = int_to_ptr.hbm [resolvable:$true] %s29_s25 }
   0x4   :  { %24 = dma.hbm_to_vmem [thread:$0]  %s20_s20, 128, %s22_s22, [#allocation4]  }
   0x5   :  { %s233_s26 = smov [#allocation6]   ;;  %s234_s28 = smov 256  }
   0x6   :  { %s31_s27 = sshll.u32 %s233_s26, 4  ;;  %s235_s29 = smov 16   ;;  %s32_s27 = int_to_ptr.vmem [resolvable:$true] %s31_s27 }
   0x7   :  { %37 = dma.hbm_to_vmem [thread:$0]  %s30_s25, 1024, %s32_s27, [#allocation7], %s234_s28, %s234_s28, %s235_s29  }
   0x8   :  { %226 = dma.done.wait [#allocation4], 128  }
   0x9   :  { %227 = vsyncadd [#allocation4], 4294967168 }
   0xa   :  { %228 = dma.done.wait [#allocation7], 1024  }
   0xb   :  { %229 = vsyncadd [#allocation7], 4294966272  ;;  %v60_v0 = vld [vmem:[#allocation6 + $0x38] sm:$0xff]  ;;  %v58_v1 = vld [vmem:[#allocation6 + $0x28] sm:$0xff]  ;;  %vm67_vm0 = vcmask 261120   ;;  %v120_v21 = vstv %s289_s4  ;;  %s135_s12 = sshll.u32 %s290_s5, 4  ;;  %s136_s12 = int_to_ptr.hbm [resolvable:$true] %s135_s12 }
   0xc   :  { %v59_v2 = vld [vmem:[#allocation6 + $0x30] sm:$0xff]  ;;  %103 = vmatpush.msra.mxu1 %v60_v0  ;;  %v57_v3 = vld [vmem:[#allocation6 + $0x20] sm:$0xff]  ;;  %v56_v4 = vld [vmem:[#allocation6 + $0x18] sm:$0xff] }
   0xd   :  { %83 = vmatpush.msra.mxu0 %v59_v2  ;;  %v55_v5 = vld [vmem:[#allocation6 + $0x10] sm:$0xff]  ;;  %v54_v6 = vld [vmem:[#allocation6 + $0x8] sm:$0xff]  ;;  %v53_v7 = vld [vmem:[#allocation6] sm:$0xff] }
   0xe   :  { %104 = vmatpush.msra.mxu1 %v58_v1  ;;  %v52_v8 = vld [vmem:[#allocation3] sm:$0xff] }
   0xf   :  { %84 = vmatpush.msra.mxu0 %v57_v3  ;;  %v61_v9 = vld [vmem:[%s287_s2] sm:$0x3]  ;;  %s236_s2 = smov [#allocation8]  }
  0x10   :  { %105 = vmatpush.msra.mxu1 %v56_v4  ;;  %v64_v10 = vperm.slane %v61_v9, 1  ;;  %v63_v11 = vperm.slane %v61_v9, 0  ;;  %v153_v17 = vld [vmem:[%s288_s3] ss:$0 sm:$0xff]  ;;  %s133_s9 = sshll.u32 %s236_s2, 4  ;;  %s134_s9 = int_to_ptr.vmem [resolvable:$true] %s133_s9 }
  0x11   :  { %85 = vmatpush.msra.mxu0 %v55_v5 }
  0x12   :  { %106 = vmatpush.msra.mxu1 %v54_v6 }
  0x13   :  { %86 = vmatpush.msra.mxu0 %v53_v7  ;;  %147 = vmatmul.msk.f32.vlgmr.msra.gmra.mxu1 %vm67_vm0, %v52_v8 }
  0x14   :  { %146 = vmatmul.msk.f32.vlgmr.msra.gmra.mxu0 %vm67_vm0, %v52_v8 }
  0x90   :  { %v108_v12 = vpop.f32.mrf.mxu1 }
  0x91   :  { %v88_v13 = vpop.f32.mrf.mxu0  ;;  %v109_v14 = vadd.f32 %v108_v12, %v64_v10 }
  0x92   :  { %v89_v15 = vadd.f32 %v88_v13, %v63_v11 }
  0x93   :  { %122 = vadd.xlane.f32.xlu0 %v109_v14 }
  0x94   :  { %v111_v16 = vmax.f32 %v89_v15, 0.0 }
  0x96   :  { %v116_v18 = vmul.f32 %v153_v17, %v111_v16 }
  0x9b   :  { %117 = vadd.xlane.f32.xlu0 %v116_v18 }
 0x106   :  { %v123_v19 = vpop.xlane.xlu0 %122 }
 0x107   :  { %v124_v20 = vmul.f32 0.0625, %v123_v19 }
 0x109   :  { %v125_v23 = vsub.f32 %v109_v14, %v124_v20 }
 0x10e   :  { %v118_v22 = vpop.xlane.xlu0 %117 }
 0x10f   :  { %v121_v24 = vadd.f32 %v120_v21, %v118_v22 }
 0x111   :  { %v126_v25 = vadd.f32 %v125_v23, %v121_v24 }
 0x113   :  { %127 = vst [vmem:[#allocation8] sm:$0xff] %v126_v25 }
 0x114   :  { %138 = dma.vmem_to_hbm [thread:$0]  %s134_s9, 128, %s136_s12, [#allocation5]  }
 0x115   :  { %230 = dma.done.wait [#allocation5], 128  }
 0x116   :  { %231 = vsyncadd [#allocation5], 4294967168 }
 0x117   :  { %143 = vsyncpa [#allocation4], 1 }
 0x118   :  { %144 = vsyncpa [#allocation7], 1 }
 0x119   :  { %145 = vsyncpa [#allocation5], 1 }

</bundles_post_ra>
